<compile_context>
chip_gen: v6e
topology: v6e:2x2x1
jax: 0.10.0
libtpu: 0.0.40
codegen_flags: <defaults>
</compile_context>

<pallas_src>
import functools
import random

import jax
import jax.numpy as jnp
import numpy as np
from jax.experimental import pallas as pl
from jax.experimental.pallas import tpu as pltpu


# -----------------------------------------------------------------------------
# fn(x): 3x3 separable Gaussian blur, zero padding (Pallas TPU kernel)
# -----------------------------------------------------------------------------
def _blur3x3_kernel(x_ref, o_ref, *, H, W, g_m1, g_0, g_p1):
    """x_ref/o_ref: (bc_tile, H*W) blocks; blur each HxW image with 3-tap filters.

    g_m1/g_0/g_p1 are the filter taps at offsets -1/0/+1 (g_m1 == g_p1 for a
    symmetric Gaussian)."""
    n = H * W
    x = x_ref[...]
    if x.dtype != jnp.float32:          # accumulate in f32 (no-op for f32 inputs)
        x = x.astype(jnp.float32)

    # Edge masks from a single (1, n) lane iota; broadcast over sublanes is free.
    col = jax.lax.broadcasted_iota(jnp.int32, (1, n), 1)
    w_idx = col % W                     # position within an image row
    left_edge = w_idx == 0
    right_edge = w_idx == W - 1
    first_row = col < W
    last_row = col >= n - W

    # --- blur along W (lane axis): 3-tap with zero padding at row edges ------
    prev_w = pltpu.roll(x, shift=1, axis=1)           # prev_w[c] = x[c-1]
    next_w = pltpu.roll(x, shift=n - 1, axis=1)       # next_w[c] = x[c+1]
    prev_w = jnp.where(left_edge, 0.0, prev_w)        # no left neighbour at w==0
    next_w = jnp.where(right_edge, 0.0, next_w)       # no right neighbour at w==W-1
    hblur = g_0 * x + g_m1 * prev_w + g_p1 * next_w

    # --- blur along H: 3-tap across rows (shift by +/-W on the flat axis) ----
    up = pltpu.roll(hblur, shift=W, axis=1)           # up[c]   = hblur[c-W]
    down = pltpu.roll(hblur, shift=n - W, axis=1)     # down[c] = hblur[c+W]
    up = jnp.where(first_row, 0.0, up)
    down = jnp.where(last_row, 0.0, down)
    blur = g_0 * hblur + g_m1 * up + g_p1 * down

    o_ref[...] = blur.astype(o_ref.dtype)


def _gauss3_weights(sigma: float):
    d = np.array([-1.0, 0.0, 1.0], dtype=np.float64)
    g = np.exp(-(d ** 2) / (2.0 * float(sigma) ** 2))
    g = g / g.sum()
    return float(g[0]), float(g[1]), float(g[2])


def _pick_bc_tile(bc: int, hw: int, itemsize: int,
                  max_block_bytes: int = 4 << 20) -> int:
    """Largest tile along the fused B*C axis that divides BC, satisfies the TPU
    sublane constraint (multiple of 8, or the full axis), and fits the budget.
    A ~4 MiB block is at the measured mem-bound sweet spot and keeps the
    double-buffered in/out blocks plus f32 temporaries well inside the 32 MiB
    scoped VMEM limit (and v7x's 64 MiB physical VMEM)."""
    candidates = [t for t in range(1, bc + 1)
                  if bc % t == 0 and (t % 8 == 0 or t == bc)]
    fitting = [t for t in candidates if t * hw * itemsize <= max_block_bytes]
    return max(fitting) if fitting else min(candidates)


def gaussian_blur3x3(x: jnp.ndarray, sigma: float = 1.0) -> jnp.ndarray:
    """3x3 Gaussian blur of NCHW x (zero padding) as a tiled Pallas TPU kernel."""
    # TODO(synk): torchvision GaussianBlur uses reflect padding and samples sigma
    # per call from a range; zero padding and a fixed sigma are used here.
    B, C, H, W = x.shape
    BC, HW = B * C, H * W
    x2 = x.reshape(BC, HW)              # lane-dense layout: last dim = H*W
    bc_tile = _pick_bc_tile(BC, HW, x.dtype.itemsize)
    g_m1, g_0, g_p1 = _gauss3_weights(sigma)

    kernel = functools.partial(_blur3x3_kernel, H=H, W=W,
                               g_m1=g_m1, g_0=g_0, g_p1=g_p1)
    out = pl.pallas_call(
        kernel,
        out_shape=jax.ShapeDtypeStruct((BC, HW), x.dtype),
        grid=(BC // bc_tile,),
        in_specs=[pl.BlockSpec((bc_tile, HW), lambda i: (i, 0))],
        out_specs=pl.BlockSpec((bc_tile, HW), lambda i: (i, 0)),
        compiler_params=pltpu.CompilerParams(
            dimension_semantics=("parallel",),
            vmem_limit_bytes=32 * 1024 * 1024,
        ),
    )(x2)
    return out.reshape(B, C, H, W)


# -----------------------------------------------------------------------------
# RandomApply: host-side coin flip + branch (no kernel launch on identity path)
# -----------------------------------------------------------------------------
def random_apply(x, p, *, sigma=1.0, u=None):
    """RandomApply(GaussianBlur3x3(sigma), p).

    The coin flip and branch are taken on the host, exactly like the PyTorch
    module's Python-level `if random.random() > self.p`. The identity path
    returns x directly: no kernel launch, no HBM round trip."""
    if u is None:
        u = random.random()
    if u > p:
        return x
    return gaussian_blur3x3(x, sigma=sigma)


class RandomApply:
    """Drop-in mirror of the PyTorch module (host-side coin flip + branch)."""

    def __init__(self, fn, p):
        self.fn = fn
        self.p = p

    def __call__(self, x):
        if random.random() > self.p:
            return x
        return self.fn(x)


# -----------------------------------------------------------------------------
# Pure-JAX reference (banded-matrix formulation, zero padding) for checking
# -----------------------------------------------------------------------------
def _gaussian_band_matrix(n: int, sigma: float) -> jnp.ndarray:
    d = jnp.array([-1.0, 0.0, 1.0], dtype=jnp.float32)
    g = jnp.exp(-(d ** 2) / (2.0 * sigma ** 2))
    g = g / jnp.sum(g)
    idx = jnp.arange(n)
    diff = idx[None, :] - idx[:, None]
    band = jnp.where(jnp.abs(diff) <= 1, g[jnp.clip(diff + 1, 0, 2)], 0.0)
    return band.astype(jnp.float32)


def _reference_blur(x, sigma=1.0):
    B, C, H, W = x.shape
    kh = _gaussian_band_matrix(H, sigma)
    kw = _gaussian_band_matrix(W, sigma)
    xf = x.astype(jnp.float32)
    hb = jnp.einsum("bchw,wk->bchk", xf, kw)
    bl = jnp.einsum("bchw,hk->bckw", hb, kh)
    return bl.astype(x.dtype)


if __name__ == "__main__":
    random.seed(0)
    key = jax.random.PRNGKey(0)

    B, C, H, W = 2, 4, 16, 16
    x = jax.random.normal(key, (B, C, H, W), dtype=jnp.float32)

    p, sigma = 0.5, 1.0

    # 1) apply branch (u <= p): Pallas blur vs pure-JAX reference
    got = jax.block_until_ready(random_apply(x, p, sigma=sigma, u=0.25))
    want = _reference_blur(x, sigma=sigma)
    np.testing.assert_allclose(np.asarray(got), np.asarray(want),
                               rtol=1e-5, atol=1e-5)

    # 2) identity branch (u > p): no kernel launch, x returned untouched
    out_id = random_apply(x, p, sigma=sigma, u=0.75)
    assert out_id is x

    # 3) module-style usage with the host-drawn (seeded, deterministic) coin
    aug = RandomApply(lambda t: gaussian_blur3x3(t, sigma=sigma), p=p)
    out = jax.block_until_ready(aug(x))
    assert out.shape == x.shape and out.dtype == x.dtype

    print("KERNEL_OK")
</pallas_src>

<mosaic_0001>
module attributes {stable_mosaic.version = 11 : i64} {
  func.func @_blur3x3_kernel(%arg0: i32, %arg1: memref<8x256xf32, #tpu.memory_space<vmem>>, %arg2: memref<8x256xf32, #tpu.memory_space<vmem>>) attributes {dimension_semantics = [#tpu.dimension_semantics<parallel>], iteration_bounds = array<i64: 1>, scalar_prefetch = 0 : i64, scratch_operands = 0 : i64, tpu.core_type = #tpu.core_type<tc>, window_params = [{transform_indices = @transform_0, window_bounds = array<i64: 8, 256>}, {transform_indices = @transform_1, window_bounds = array<i64: 8, 256>}]} {
    %c0 = arith.constant 0 : index
    %c0_0 = arith.constant 0 : index
    %0 = vector.load %arg1[%c0, %c0_0] : memref<8x256xf32, #tpu.memory_space<vmem>>, vector<8x256xf32>
    %1 = tpu.iota {dimensions = array<i32: 1>} : vector<1x256xi32>
    %c16_i32 = arith.constant 16 : i32
    %c0_i32 = arith.constant 0 : i32
    %2 = arith.cmpi eq, %c16_i32, %c0_i32 : i32
    %c1_i32 = arith.constant 1 : i32
    %3 = arith.select %2, %c1_i32, %c16_i32 : i32
    %4 = vector.broadcast %3 : i32 to vector<1x256xi32>
    %5 = arith.remsi %1, %4 : vector<1x256xi32>
    %c0_i32_1 = arith.constant 0 : i32
    %6 = vector.broadcast %c0_i32_1 : i32 to vector<1x256xi32>
    %7 = arith.cmpi ne, %5, %6 : vector<1x256xi32>
    %c0_i32_2 = arith.constant 0 : i32
    %8 = vector.broadcast %c0_i32_2 : i32 to vector<1x256xi32>
    %9 = arith.cmpi slt, %5, %8 : vector<1x256xi32>
    %c0_i32_3 = arith.constant 0 : i32
    %10 = arith.cmpi slt, %3, %c0_i32_3 : i32
    %11 = vector.broadcast %10 : i1 to vector<1x256xi1>
    %12 = vector.broadcast %11 : vector<1x256xi1> to vector<1x256xi1>
    %13 = arith.xori %9, %12 : vector<1x256xi1>
    %14 = arith.andi %13, %7 : vector<1x256xi1>
    %15 = vector.broadcast %3 : i32 to vector<1x256xi32>
    %16 = arith.addi %5, %15 : vector<1x256xi32>
    %17 = arith.select %14, %16, %5 : vector<1x256xi1>, vector<1x256xi32>
    %c0_i32_4 = arith.constant 0 : i32
    %18 = vector.broadcast %c0_i32_4 : i32 to vector<1x256xi32>
    %19 = arith.cmpi eq, %17, %18 : vector<1x256xi32>
    %c15_i32 = arith.constant 15 : i32
    %20 = vector.broadcast %c15_i32 : i32 to vector<1x256xi32>
    %21 = arith.cmpi eq, %17, %20 : vector<1x256xi32>
    %c16_i32_5 = arith.constant 16 : i32
    %22 = vector.broadcast %c16_i32_5 : i32 to vector<1x256xi32>
    %23 = arith.cmpi slt, %1, %22 : vector<1x256xi32>
    %c240_i32 = arith.constant 240 : i32
    %24 = vector.broadcast %c240_i32 : i32 to vector<1x256xi32>
    %25 = arith.cmpi sge, %1, %24 : vector<1x256xi32>
    %c1_i32_6 = arith.constant 1 : i32
    %26 = tpu.dynamic_rotate %0 by %c1_i32_6 dim 1 : vector<8x256xf32>, i32 -> vector<8x256xf32>
    %c255_i32 = arith.constant 255 : i32
    %27 = tpu.dynamic_rotate %0 by %c255_i32 dim 1 : vector<8x256xf32>, i32 -> vector<8x256xf32>
    %cst = arith.constant 0.000000e+00 : f32
    %28 = vector.shape_cast %19 : vector<1x256xi1> to vector<1x256xi1>
    %29 = vector.broadcast %28 : vector<1x256xi1> to vector<8x256xi1>
    %30 = vector.broadcast %cst : f32 to vector<8x256xf32>
    %31 = arith.select %29, %30, %26 : vector<8x256xi1>, vector<8x256xf32>
    %cst_7 = arith.constant 0.000000e+00 : f32
    %32 = vector.shape_cast %21 : vector<1x256xi1> to vector<1x256xi1>
    %33 = vector.broadcast %32 : vector<1x256xi1> to vector<8x256xi1>
    %34 = vector.broadcast %cst_7 : f32 to vector<8x256xf32>
    %35 = arith.select %33, %34, %27 : vector<8x256xi1>, vector<8x256xf32>
    %cst_8 = arith.constant 0.451862752 : f32
    %36 = vector.broadcast %cst_8 : f32 to vector<8x256xf32>
    %37 = arith.mulf %36, %0 : vector<8x256xf32>
    %cst_9 = arith.constant 0.274068624 : f32
    %38 = vector.broadcast %cst_9 : f32 to vector<8x256xf32>
    %39 = arith.mulf %38, %31 : vector<8x256xf32>
    %40 = arith.addf %37, %39 : vector<8x256xf32>
    %cst_10 = arith.constant 0.274068624 : f32
    %41 = vector.broadcast %cst_10 : f32 to vector<8x256xf32>
    %42 = arith.mulf %41, %35 : vector<8x256xf32>
    %43 = arith.addf %40, %42 : vector<8x256xf32>
    %c16_i32_11 = arith.constant 16 : i32
    %44 = tpu.dynamic_rotate %43 by %c16_i32_11 dim 1 : vector<8x256xf32>, i32 -> vector<8x256xf32>
    %c240_i32_12 = arith.constant 240 : i32
    %45 = tpu.dynamic_rotate %43 by %c240_i32_12 dim 1 : vector<8x256xf32>, i32 -> vector<8x256xf32>
    %cst_13 = arith.constant 0.000000e+00 : f32
    %46 = vector.shape_cast %23 : vector<1x256xi1> to vector<1x256xi1>
    %47 = vector.broadcast %46 : vector<1x256xi1> to vector<8x256xi1>
    %48 = vector.broadcast %cst_13 : f32 to vector<8x256xf32>
    %49 = arith.select %47, %48, %44 : vector<8x256xi1>, vector<8x256xf32>
    %cst_14 = arith.constant 0.000000e+00 : f32
    %50 = vector.shape_cast %25 : vector<1x256xi1> to vector<1x256xi1>
    %51 = vector.broadcast %50 : vector<1x256xi1> to vector<8x256xi1>
    %52 = vector.broadcast %cst_14 : f32 to vector<8x256xf32>
    %53 = arith.select %51, %52, %45 : vector<8x256xi1>, vector<8x256xf32>
    %cst_15 = arith.constant 0.451862752 : f32
    %54 = vector.broadcast %cst_15 : f32 to vector<8x256xf32>
    %55 = arith.mulf %54, %43 : vector<8x256xf32>
    %cst_16 = arith.constant 0.274068624 : f32
    %56 = vector.broadcast %cst_16 : f32 to vector<8x256xf32>
    %57 = arith.mulf %56, %49 : vector<8x256xf32>
    %58 = arith.addf %55, %57 : vector<8x256xf32>
    %cst_17 = arith.constant 0.274068624 : f32
    %59 = vector.broadcast %cst_17 : f32 to vector<8x256xf32>
    %60 = arith.mulf %59, %53 : vector<8x256xf32>
    %61 = arith.addf %58, %60 : vector<8x256xf32>
    %c0_18 = arith.constant 0 : index
    %c0_19 = arith.constant 0 : index
    %62 = vector.load %arg2[%c0_18, %c0_19] : memref<8x256xf32, #tpu.memory_space<vmem>>, vector<8x256xf32>
    tpu.vector_store %arg2[%c0_18, %c0_19], %61 {strides = array<i32>} : memref<8x256xf32, #tpu.memory_space<vmem>>, vector<8x256xf32>,
    return
  }
  func.func @transform_0(%arg0: i32) -> (i32, i32) {
    %c0_i32 = arith.constant 0 : i32
    %c0_i32_0 = arith.constant 0 : i32
    return %arg0, %c0_i32 : i32, i32
  }
  func.func @transform_1(%arg0: i32) -> (i32, i32) {
    %c0_i32 = arith.constant 0 : i32
    %c0_i32_0 = arith.constant 0 : i32
    return %arg0, %c0_i32 : i32, i32
  }
}

</mosaic_0001>

<bundles_post_ra>
// kernel: tpu_custom_call.1
= control target key start
LH: loop header
LB: loop body
LE: loop exit
PB: predicated region body
PF: predicated region fallthrough
CT: control target
= control target key end

     0   :  { %6 = vsyncpa [#allocation3], 0  ;;  %s230_s0 = inlined_call_operand.hbm [shape: f32[8,256], index: 0, kind: input, shape index: {}]   ;;  %s231_s1 = inlined_call_operand.hbm [shape: f32[8,256], index: 1, kind: output, shape index: {}]  }
   0x1   :  { %7 = vsyncpa [#allocation4], 0  ;;  %s196_s6 = smov [#allocation2]  }
   0x2   :  { %s14_s7 = sshll.u32 %s196_s6, 4  ;;  %s15_s7 = int_to_ptr.vmem [resolvable:$true] %s14_s7 }
   0x3   :  { %s160_s8 = scalar_lea.vmem %s15_s7, 256  ;;  %p165_p1 = scmp.lt.s32.totalorder %s15_s7, %s15_s7 }
   0x4   :  { %p161_p0 = scmp.ne.s32.totalorder %s15_s7, %s160_s8  ;;  %p166_p2 = scmp.lt.s32.totalorder %s160_s8, %s160_s8 }
   0x6   :  { %p167_p3 = por %p166_p2, %p165_p1 }
   0x8   :  { %p168_p4 = pnand %p167_p3, %p161_p0 }
   0xa   :  { %171 = shalt.err (!%p168_p4)
}
   0xb   :  { %17 = dma.hbm_to_vmem [thread:$0]  %s230_s0, 256, %s15_s7, [#allocation3]  }
   0xc   :  { %192 = dma.done.wait [#allocation3], 256  }
   0xd   :  { %193 = vsyncadd [#allocation3], 4294967040  ;;  %v21_v0 = vld [vmem:[#allocation2] sm:$0xff]  ;;  %s197_s11 = smov 127   ;;  %s198_s12 = smov 1   ;;  %v22_v1 = vld [vmem:[#allocation2 + $0x8] sm:$0xff]  ;;  %v23_v2 = vlaneseq }
   0xe   :  { %65 = vrot.lane.b32.xlu1 %v21_v0, %s197_s11  ;;  %58 = vrot.lane.b32.xlu0 %v21_v0, %s198_s12  ;;  %v84_v10 = vmul.f32 0.45186275, %v21_v0  ;;  %v85_v18 = vmul.f32 0.45186275, %v22_v1  ;;  %s199_s0 = smov 16   ;;  %s200_s13 = smov 112  }
   0xf   :  { %v24_v3 = vand.u32 127, %v23_v2  ;;  %s201_s14 = smov [#allocation5]  }
  0x10   :  { %s137_s15 = sshll.u32 %s201_s14, 4  ;;  %s138_s15 = int_to_ptr.vmem [resolvable:$true] %s137_s15 }
  0x11   :  { %v25_v4 = vadd.s32 128, %v24_v3  ;;  %v30_v5 = vand.u32 15, %v24_v3  ;;  %vm69_vm0 = vcmp.lt.s32.totalorder %v24_v3, 127  ;;  %vm62_vm1 = vcmp.lt.s32.totalorder %v24_v3, 1  ;;  %s172_s16 = scalar_lea.vmem %s138_s15, 256  ;;  %p177_p6 = scmp.lt.s32.totalorder %s138_s15, %s138_s15 }
  0x12   :  { %67 = vrot.lane.b32.xlu1 %v22_v1, %s197_s11  ;;  %60 = vrot.lane.b32.xlu0 %v22_v1, %s198_s12  ;;  %vm54_vm6 = vcmp.lt.s32.totalorder %v24_v3, 16  ;;  %vm104_vm8 = vcmp.lt.s32.totalorder %v24_v3, 112  ;;  %p173_p5 = scmp.ne.s32.totalorder %s138_s15, %s172_s16  ;;  %p178_p7 = scmp.lt.s32.totalorder %s172_s16, %s172_s16 }
  0x13   :  { %v37_v6 = vand.u32 15, %v25_v4  ;;  %vm215_vm2 = vcmp.eq.s32.totalorder %v30_v5, 15  ;;  %vm50_vm3 = vcmp.eq.s32.totalorder %v30_v5, 0  ;;  %vm57_vm7 = vcmp.ge.s32.totalorder %v25_v4, 240 }
  0x14   :  { %p179_p8 = por %p178_p7, %p177_p6 }
  0x15   :  { %vm51_vm4 = vcmp.eq.s32.totalorder %v37_v6, 0  ;;  %vm219_vm5 = vcmp.eq.s32.totalorder %v37_v6, 15 }
  0x16   :  { %p180_p9 = pnand %p179_p8, %p173_p5 }
  0x80   :  { %v66_v7 = vpop.permute.xlu1 %65  ;;  %v59_v8 = vpop.permute.xlu0 %58 }
  0x84   :  { %v68_v12 = vpop.permute.xlu1 %67  ;;  %v61_v13 = vpop.permute.xlu0 %60 }
  0x85   :  { %v70_v14 = vsel %vm69_vm0, %v66_v7, %v68_v12  ;;  %v71_v15 = vsel %vm69_vm0, %v68_v12, %v66_v7  ;;  %v63_v16 = vsel %vm62_vm1, %v59_v8, %v61_v13  ;;  %v64_v17 = vsel %vm62_vm1, %v61_v13, %v59_v8 }
  0x86   :  { %v82_v19 = vsel %vm215_vm2, 0.0, %v70_v14  ;;  %v76_v20 = vsel %vm50_vm3, 0.0, %v64_v17  ;;  %v77_v21 = vsel %vm51_vm4, 0.0, %v63_v16  ;;  %v83_v22 = vsel %vm219_vm5, 0.0, %v71_v15 }
  0x87   :  { %v86_v23 = vmul.f32 0.27406862, %v76_v20  ;;  %v87_v24 = vmul.f32 0.27406862, %v77_v21  ;;  %v90_v25 = vmul.f32 0.27406862, %v82_v19 }
  0x88   :  { %v91_v27 = vmul.f32 0.27406862, %v83_v22 }
  0x89   :  { %v88_v26 = vadd.f32 %v86_v23, %v84_v10  ;;  %v89_v28 = vadd.f32 %v87_v24, %v85_v18 }
  0x8b   :  { %v92_v29 = vadd.f32 %v90_v25, %v88_v26  ;;  %v93_v30 = vadd.f32 %v91_v27, %v89_v28 }
  0x8d   :  { %94 = vrot.lane.b32.xlu0 %v92_v29, %s199_s0  ;;  %96 = vrot.lane.b32.xlu1 %v93_v30, %s199_s0  ;;  %v119_v36 = vmul.f32 0.45186275, %v92_v29  ;;  %v120_v41 = vmul.f32 0.45186275, %v93_v30 }
  0x91   :  { %100 = vrot.lane.b32.xlu0 %v92_v29, %s200_s13  ;;  %102 = vrot.lane.b32.xlu1 %v93_v30, %s200_s13 }
  0xff   :  { %v95_v31 = vpop.permute.xlu0 %94  ;;  %v97_v32 = vpop.permute.xlu1 %96 }
 0x100   :  { %v98_v33 = vsel %vm54_vm6, %v95_v31, %v97_v32  ;;  %v99_v34 = vsel %vm54_vm6, %v97_v32, %v95_v31 }
 0x101   :  { %v111_v35 = vsel %vm54_vm6, 0.0, %v99_v34  ;;  %v122_v38 = vmul.f32 0.27406862, %v98_v33 }
 0x102   :  { %v121_v37 = vmul.f32 0.27406862, %v111_v35 }
 0x103   :  { %v101_v39 = vpop.permute.xlu0 %100  ;;  %v103_v40 = vpop.permute.xlu1 %102  ;;  %v124_v47 = vadd.f32 %v122_v38, %v120_v41 }
 0x104   :  { %v123_v42 = vadd.f32 %v121_v37, %v119_v36  ;;  %v105_v43 = vsel %vm104_vm8, %v101_v39, %v103_v40  ;;  %v106_v44 = vsel %vm104_vm8, %v103_v40, %v101_v39 }
 0x105   :  { %v118_v45 = vsel %vm57_vm7, 0.0, %v106_v44  ;;  %v125_v46 = vmul.f32 0.27406862, %v105_v43 }
 0x106   :  { %v126_v48 = vmul.f32 0.27406862, %v118_v45 }
 0x107   :  { %v127_v49 = vadd.f32 %v125_v46, %v123_v42 }
 0x108   :  { %v128_v50 = vadd.f32 %v126_v48, %v124_v47 }
 0x109   :  { %129 = vst [vmem:[#allocation5] sm:$0xff] %v127_v49 }
 0x10a   :  { %130 = vst [vmem:[#allocation5 + $0x8] sm:$0xff] %v128_v50 }
 0x10b   :  { %183 = shalt.err (!%p180_p9)
}
 0x10c   :  { %140 = dma.vmem_to_hbm [thread:$0]  %s138_s15, 256, %s231_s1, [#allocation4]  }
 0x10d   :  { %194 = dma.done.wait [#allocation4], 256  }
 0x10e   :  { %195 = vsyncadd [#allocation4], 4294967040 }
 0x10f   :  { %144 = vsyncpa [#allocation3], 1 }
 0x110   :  { %145 = vsyncpa [#allocation4], 1 }

</bundles_post_ra>
